<compile_context>
chip_gen: v6e
topology: v6e:2x2x1
jax: 0.10.0
libtpu: 0.0.40
codegen_flags: <defaults>
</compile_context>

<pallas_src>
import jax
import jax.numpy as jnp
import numpy as np
from jax.experimental import pallas as pl
from jax.experimental.pallas import tpu as pltpu

N_SAMPLE = 128
POS_RATIO = 0.25
POS_CAP = int(N_SAMPLE * POS_RATIO)          # 32
POS_IOU_THRESH = 0.5
NEG_IOU_THRESH_HI = 0.5
NEG_IOU_THRESH_LO = 0.0


def _ptl_kernel(roi_ref, gt_ref, outf_ref, outi_ref):
    # roi_ref: (1, 4, R) f32 transposed rois
    # gt_ref : (1, G, 5) f32 -> cols 0-3 gt box, col 4 label
    roi_t = roi_ref[0]                        # (4, R)
    gta = gt_ref[0]                           # (G, 5)

    G = gta.shape[0]
    R = roi_t.shape[1]
    NS = N_SAMPLE

    xa1 = roi_t[0:1, :]
    ya1 = roi_t[1:2, :]
    xa2 = roi_t[2:3, :]
    ya2 = roi_t[3:4, :]                       # (1, R)

    xb1 = gta[:, 0:1]
    yb1 = gta[:, 1:2]
    xb2 = gta[:, 2:3]
    yb2 = gta[:, 3:4]                         # (G, 1)
    lab = gta[:, 4:5]                         # (G, 1)

    roi_area = (ya2 - ya1) * (xa2 - xa1)      # (1, R)
    gt_area = (yb2 - yb1) * (xb2 - xb1)       # (G, 1)

    ix1 = jnp.maximum(xa1, xb1)               # (G, R)
    iy1 = jnp.maximum(ya1, yb1)
    ix2 = jnp.minimum(xa2, xb2)
    iy2 = jnp.minimum(ya2, yb2)

    overlap = (ix1 < ix2) & (iy1 < iy2)
    inter = (iy2 - iy1) * (ix2 - ix1)
    denom = jnp.where(overlap, roi_area + gt_area - inter, jnp.float32(1.0))
    # exact division: IoU values feed the 0.5 pos/neg threshold.
    iou = jnp.where(overlap, inter / denom, jnp.float32(0.0))        # (G, R)

    # per-roi max over gt + first-argmax (matches np.argmax tie-breaking)
    max_iou = jnp.max(iou, axis=0, keepdims=True)                    # (1, R)
    g_row = jax.lax.broadcasted_iota(jnp.int32, (G, R), 0)
    asg = jnp.min(jnp.where(iou == max_iou, g_row, G),
                  axis=0, keepdims=True)                             # (1, R)

    # one-hot "gather" of the assigned gt box / label (sublane sums)
    onehot = (g_row == asg).astype(jnp.float32)                      # (G, R)
    bx1 = jnp.sum(onehot * xb1, axis=0, keepdims=True)               # (1, R)
    by1 = jnp.sum(onehot * yb1, axis=0, keepdims=True)
    bx2 = jnp.sum(onehot * xb2, axis=0, keepdims=True)
    by2 = jnp.sum(onehot * yb2, axis=0, keepdims=True)
    roi_lab = jnp.sum(onehot * lab, axis=0, keepdims=True)           # (1, R)

    # bbox regression targets for every roi (selected rows extracted below)
    eps = jnp.float32(np.finfo(np.float32).eps)
    w0 = xa2 - xa1
    h0 = ya2 - ya1
    cx = xa1 + 0.5 * w0
    cy = ya1 + 0.5 * h0
    bw = bx2 - bx1
    bh = by2 - by1
    bcx = bx1 + 0.5 * bw
    bcy = by1 + 0.5 * bh
    inv_w = pl.reciprocal(jnp.maximum(w0, eps), approx=False)
    inv_h = pl.reciprocal(jnp.maximum(h0, eps), approx=False)
    dx = (bcx - cx) * inv_w
    dy = (bcy - cy) * inv_h
    # clamp gt extents so degenerate/padded gt boxes give finite dw/dh
    # (-inf would become NaN in the 0-weighted MXU gather below).
    dw = jnp.log(jnp.maximum(bw, eps) * inv_w)
    dh = jnp.log(jnp.maximum(bh, eps) * inv_h)

    # ---- pos/neg classification + deterministic first-K sampling ----
    pos_mask = max_iou >= POS_IOU_THRESH                             # (1, R)
    neg_mask = (max_iou < NEG_IOU_THRESH_HI) & (max_iou >= NEG_IOU_THRESH_LO)
    pos_i = pos_mask.astype(jnp.int32)
    neg_i = neg_mask.astype(jnp.int32)

    # inclusive prefix counts along lanes via a log2(R)-step roll/add scan
    # (XLU rotations; no (R,R) tri matrix, no MXU fill).
    lane = jax.lax.broadcasted_iota(jnp.int32, (1, R), 1)            # (1, R)
    cnt = jnp.concatenate([pos_i, neg_i], axis=0)                    # (2, R)
    shift = 1
    while shift < R:
        shifted = pltpu.roll(cnt, shift, axis=1)                     # x[(i-shift) % R]
        cnt = cnt + jnp.where(lane >= shift, shifted, 0)
        shift *= 2
    pos_rank = cnt[0:1, :] - 1                                       # (1, R)
    neg_rank = cnt[1:2, :] - 1

    n_pos = jnp.sum(pos_i, axis=1, keepdims=True)                    # (1, 1)
    n_neg = jnp.sum(neg_i, axis=1, keepdims=True)
    n_pos_sel = jnp.minimum(jnp.int32(POS_CAP), n_pos)
    n_neg_sel = jnp.minimum(jnp.int32(NS) - n_pos_sel, n_neg)

    # output slot for each roi (NS == invalid / not sampled)
    slot = jnp.where(pos_mask & (pos_rank < n_pos_sel), pos_rank,
                     jnp.where(neg_mask & (neg_rank < n_neg_sel),
                               n_pos_sel + neg_rank, jnp.int32(NS)))  # (1, R)

    # pre-transposed selection matrix sel_t[r, j] = 1 iff roi r -> output slot j,
    # built from a tiny (8,R) -> (R,8) transpose of slot (no 128x128 vxpose on
    # the matmul RHS).
    slot_col = jnp.transpose(
        jnp.broadcast_to(slot.astype(jnp.float32), (8, R)))[:, 0:1]   # (R, 1)
    slot_col = slot_col.astype(jnp.int32)
    j_col = jax.lax.broadcasted_iota(jnp.int32, (R, NS), 1)
    sel_t = (j_col == slot_col).astype(jnp.float32)                   # (R, NS)

    # one fused MXU gather: rows 0-3 sampled roi, 4-7 bbox targets, 8 label.
    # f32 everywhere: each output element is exactly one payload value (or 0).
    payload = jnp.concatenate([roi_t, dx, dy, dw, dh, roi_lab], axis=0)   # (9, R)
    gathered = jnp.dot(payload, sel_t,
                       preferred_element_type=jnp.float32)                # (9, NS)

    j_lane = jax.lax.broadcasted_iota(jnp.int32, (1, NS), 1)
    lab_sel = jnp.where(j_lane < n_pos_sel, gathered[8:9, :], jnp.float32(0.0))
    valid = (j_lane < (n_pos_sel + n_neg_sel)).astype(jnp.int32)
    # labels are non-negative class ids, so +0.5 then truncation == rounding
    lab_i = (lab_sel + jnp.float32(0.5)).astype(jnp.int32)

    outf_ref[0] = gathered[0:8, :]                                    # (8, NS)
    outi_ref[0] = jnp.concatenate([lab_i, valid], axis=0)             # (2, NS)


def proposal_target_layer(roi, gt_boxes, labels, image):
    """roi: (B,R,4) f32, gt_boxes: (B,G,4) f32, labels: (B,G) int32,
    image: (B,3,H,W) (unused; visualization not supported)."""
    del image  # TODO(synk): cv2 visualization omitted (no Pallas equivalent)
    B, R, _ = roi.shape
    G = gt_boxes.shape[1]
    NS = N_SAMPLE

    roi_t = jnp.transpose(roi, (0, 2, 1)).astype(jnp.float32)        # (B, 4, R)
    gt_aug = jnp.concatenate(
        [gt_boxes.astype(jnp.float32),
         labels.astype(jnp.float32)[..., None]], axis=-1)            # (B, G, 5)

    out_shapes = (
        jax.ShapeDtypeStruct((B, 8, NS), jnp.float32),   # rows 0-3 roi, 4-7 bbox
        jax.ShapeDtypeStruct((B, 2, NS), jnp.int32),     # row 0 label, row 1 valid
    )
    packed_f, packed_i = pl.pallas_call(
        _ptl_kernel,
        out_shape=out_shapes,
        grid_spec=pltpu.PrefetchScalarGridSpec(
            num_scalar_prefetch=0,
            grid=(B,),
            in_specs=[
                pl.BlockSpec((1, 4, R), lambda b: (b, 0, 0)),
                pl.BlockSpec((1, G, 5), lambda b: (b, 0, 0)),
            ],
            out_specs=[
                pl.BlockSpec((1, 8, NS), lambda b: (b, 0, 0)),
                pl.BlockSpec((1, 2, NS), lambda b: (b, 0, 0)),
            ],
        ),
        compiler_params=pltpu.CompilerParams(
            dimension_semantics=("parallel",)),   # batch items independent (2 TCs on v7x)
    )(roi_t, gt_aug)

    packed = jnp.transpose(packed_f, (0, 2, 1))                      # (B, NS, 8)
    sample_roi = packed[:, :, 0:4]                                   # (B, NS, 4)
    gt_roi_bbox = packed[:, :, 4:8]                                  # (B, NS, 4)
    gt_roi_labels = packed_i[:, 0, :]                                # (B, NS)
    valid_mask = packed_i[:, 1, :].astype(jnp.bool_)                 # (B, NS)
    return sample_roi, gt_roi_labels, gt_roi_bbox, valid_mask


def _numpy_reference(roi, gt_boxes, labels):
    """Pure-numpy mirror of the kernel semantics (first-K deterministic sampling)."""
    B, R, _ = roi.shape
    G = gt_boxes.shape[1]
    NS = N_SAMPLE
    srois = np.zeros((B, NS, 4), np.float32)
    slabs = np.zeros((B, NS), np.int32)
    sbbox = np.zeros((B, NS, 4), np.float32)
    svalid = np.zeros((B, NS), bool)
    eps = np.finfo(np.float32).eps
    for b in range(B):
        ious = np.zeros((R, G), np.float32)
        for i in range(R):
            xa1, ya1, xa2, ya2 = roi[b, i]
            aa = (ya2 - ya1) * (xa2 - xa1)
            for g in range(G):
                xb1, yb1, xb2, yb2 = gt_boxes[b, g]
                ga = (yb2 - yb1) * (xb2 - xb1)
                ix1, iy1 = max(xb1, xa1), max(yb1, ya1)
                ix2, iy2 = min(xb2, xa2), min(yb2, ya2)
                if ix1 < ix2 and iy1 < iy2:
                    it = (iy2 - iy1) * (ix2 - ix1)
                    ious[i, g] = it / (aa + ga - it)
        asg = ious.argmax(axis=1)
        miou = ious.max(axis=1)
        pos_idx = np.where(miou >= POS_IOU_THRESH)[0]
        n_pos_sel = int(min(POS_CAP, pos_idx.size))
        pos_idx = pos_idx[:n_pos_sel]
        neg_idx = np.where((miou < NEG_IOU_THRESH_HI) & (miou >= NEG_IOU_THRESH_LO))[0]
        n_neg_sel = int(min(NS - n_pos_sel, neg_idx.size))
        neg_idx = neg_idx[:n_neg_sel]
        keep = np.concatenate([pos_idx, neg_idx]).astype(np.int64)
        nk = keep.size
        sr = roi[b, keep]
        lab = labels[b][asg[keep]].copy()
        lab[n_pos_sel:] = 0
        bb = gt_boxes[b, asg[keep]]
        w = sr[:, 2] - sr[:, 0]
        h = sr[:, 3] - sr[:, 1]
        cx = sr[:, 0] + 0.5 * w
        cy = sr[:, 1] + 0.5 * h
        bw = bb[:, 2] - bb[:, 0]
        bh = bb[:, 3] - bb[:, 1]
        bcx = bb[:, 0] + 0.5 * bw
        bcy = bb[:, 1] + 0.5 * bh
        w = np.maximum(w, eps)
        h = np.maximum(h, eps)
        dx = (bcx - cx) / w
        dy = (bcy - cy) / h
        dw = np.log(bw / w)
        dh = np.log(bh / h)
        srois[b, :nk] = sr
        slabs[b, :nk] = lab
        sbbox[b, :nk] = np.stack([dx, dy, dw, dh], axis=1)
        svalid[b, :nk] = True
    return srois, slabs, sbbox, svalid


if __name__ == "__main__":
    key = jax.random.PRNGKey(0)
    B, R, G, H, W = 2, 128, 8, 16, 16
    k1, k2, k3, k4, k5 = jax.random.split(key, 5)

    roi_xy = jax.random.uniform(k1, (B, R, 2), minval=0.0, maxval=80.0)
    roi_wh = jax.random.uniform(k2, (B, R, 2), minval=4.0, maxval=40.0)
    roi = jnp.concatenate([roi_xy, roi_xy + roi_wh], axis=-1).astype(jnp.float32)

    gt_xy = jax.random.uniform(k3, (B, G, 2), minval=0.0, maxval=80.0)
    gt_wh = jax.random.uniform(k4, (B, G, 2), minval=8.0, maxval=40.0)
    gt_boxes = jnp.concatenate([gt_xy, gt_xy + gt_wh], axis=-1).astype(jnp.float32)

    labels = jax.random.randint(k5, (B, G), 1, 5, dtype=jnp.int32)
    image = jnp.zeros((B, 3, H, W), jnp.float32)

    fn = jax.jit(proposal_target_layer)
    sample_roi, gt_roi_labels, gt_roi_bbox, valid = fn(roi, gt_boxes, labels, image)
    jax.block_until_ready((sample_roi, gt_roi_labels, gt_roi_bbox, valid))

    assert sample_roi.shape == (B, N_SAMPLE, 4)
    assert gt_roi_labels.shape == (B, N_SAMPLE)
    assert gt_roi_bbox.shape == (B, N_SAMPLE, 4)
    assert valid.shape == (B, N_SAMPLE)
    assert bool(jnp.all(jnp.isfinite(gt_roi_bbox)))

    r_roi, r_lab, r_bbox, r_valid = _numpy_reference(
        np.asarray(roi), np.asarray(gt_boxes), np.asarray(labels))
    np.testing.assert_array_equal(np.asarray(valid), r_valid)
    np.testing.assert_array_equal(np.asarray(gt_roi_labels), r_lab)
    np.testing.assert_allclose(np.asarray(sample_roi), r_roi, rtol=1e-5, atol=1e-5)
    np.testing.assert_allclose(np.asarray(gt_roi_bbox), r_bbox, rtol=1e-4, atol=1e-4)

    print("KERNEL_OK")
</pallas_src>

<mosaic_0001>
module attributes {stable_mosaic.version = 11 : i64} {
  func.func @_ptl_kernel(%arg0: i32, %arg1: memref<1x4x128xf32, #tpu.memory_space<vmem>>, %arg2: memref<1x8x5xf32, #tpu.memory_space<vmem>>, %arg3: memref<1x8x128xf32, #tpu.memory_space<vmem>>, %arg4: memref<1x2x128xi32, #tpu.memory_space<vmem>>) attributes {dimension_semantics = [#tpu.dimension_semantics<parallel>], iteration_bounds = array<i64: 2>, scalar_prefetch = 0 : i64, scratch_operands = 0 : i64, tpu.core_type = #tpu.core_type<tc>, window_params = [{transform_indices = @transform_0, window_bounds = array<i64: 1, 4, 128>}, {transform_indices = @transform_1, window_bounds = array<i64: 1, 8, 5>}, {transform_indices = @transform_2, window_bounds = array<i64: 1, 8, 128>}, {transform_indices = @transform_3, window_bounds = array<i64: 1, 2, 128>}]} {
    %c0 = arith.constant 0 : index
    %c0_0 = arith.constant 0 : index
    %c0_1 = arith.constant 0 : index
    %0 = vector.load %arg1[%c0, %c0_0, %c0_1] : memref<1x4x128xf32, #tpu.memory_space<vmem>>, vector<1x4x128xf32>
    %1 = vector.shape_cast %0 : vector<1x4x128xf32> to vector<4x128xf32>
    %c0_2 = arith.constant 0 : index
    %c0_3 = arith.constant 0 : index
    %c0_4 = arith.constant 0 : index
    %2 = vector.load %arg2[%c0_2, %c0_3, %c0_4] : memref<1x8x5xf32, #tpu.memory_space<vmem>>, vector<1x8x5xf32>
    %3 = vector.shape_cast %2 : vector<1x8x5xf32> to vector<8x5xf32>
    %4 = vector.extract_strided_slice %1 {offsets = [0, 0], sizes = [1, 128], strides = [1, 1]} : vector<4x128xf32> to vector<1x128xf32>
    %5 = vector.extract_strided_slice %1 {offsets = [1, 0], sizes = [1, 128], strides = [1, 1]} : vector<4x128xf32> to vector<1x128xf32>
    %6 = vector.extract_strided_slice %1 {offsets = [2, 0], sizes = [1, 128], strides = [1, 1]} : vector<4x128xf32> to vector<1x128xf32>
    %7 = vector.extract_strided_slice %1 {offsets = [3, 0], sizes = [1, 128], strides = [1, 1]} : vector<4x128xf32> to vector<1x128xf32>
    %8 = vector.extract_strided_slice %3 {offsets = [0, 0], sizes = [8, 1], strides = [1, 1]} : vector<8x5xf32> to vector<8x1xf32>
    %9 = vector.extract_strided_slice %3 {offsets = [0, 1], sizes = [8, 1], strides = [1, 1]} : vector<8x5xf32> to vector<8x1xf32>
    %10 = vector.extract_strided_slice %3 {offsets = [0, 2], sizes = [8, 1], strides = [1, 1]} : vector<8x5xf32> to vector<8x1xf32>
    %11 = vector.extract_strided_slice %3 {offsets = [0, 3], sizes = [8, 1], strides = [1, 1]} : vector<8x5xf32> to vector<8x1xf32>
    %12 = vector.extract_strided_slice %3 {offsets = [0, 4], sizes = [8, 1], strides = [1, 1]} : vector<8x5xf32> to vector<8x1xf32>
    %13 = arith.subf %7, %5 : vector<1x128xf32>
    %14 = arith.subf %6, %4 : vector<1x128xf32>
    %15 = arith.mulf %13, %14 : vector<1x128xf32>
    %16 = arith.subf %11, %9 : vector<8x1xf32>
    %17 = arith.subf %10, %8 : vector<8x1xf32>
    %18 = arith.mulf %16, %17 : vector<8x1xf32>
    %19 = vector.broadcast %4 : vector<1x128xf32> to vector<8x128xf32>
    %20 = vector.broadcast %8 : vector<8x1xf32> to vector<8x128xf32>
    %21 = arith.maximumf %19, %20 : vector<8x128xf32>
    %22 = vector.broadcast %5 : vector<1x128xf32> to vector<8x128xf32>
    %23 = vector.broadcast %9 : vector<8x1xf32> to vector<8x128xf32>
    %24 = arith.maximumf %22, %23 : vector<8x128xf32>
    %25 = vector.broadcast %6 : vector<1x128xf32> to vector<8x128xf32>
    %26 = vector.broadcast %10 : vector<8x1xf32> to vector<8x128xf32>
    %27 = arith.minimumf %25, %26 : vector<8x128xf32>
    %28 = vector.broadcast %7 : vector<1x128xf32> to vector<8x128xf32>
    %29 = vector.broadcast %11 : vector<8x1xf32> to vector<8x128xf32>
    %30 = arith.minimumf %28, %29 : vector<8x128xf32>
    %31 = arith.cmpf olt, %21, %27 : vector<8x128xf32>
    %32 = arith.cmpf olt, %24, %30 : vector<8x128xf32>
    %33 = arith.andi %31, %32 : vector<8x128xi1>
    %34 = arith.subf %30, %24 : vector<8x128xf32>
    %35 = arith.subf %27, %21 : vector<8x128xf32>
    %36 = arith.mulf %34, %35 : vector<8x128xf32>
    %37 = vector.broadcast %15 : vector<1x128xf32> to vector<8x128xf32>
    %38 = vector.broadcast %18 : vector<8x1xf32> to vector<8x128xf32>
    %39 = arith.addf %37, %38 : vector<8x128xf32>
    %40 = arith.subf %39, %36 : vector<8x128xf32>
    %cst = arith.constant 1.000000e+00 : f32
    %41 = vector.broadcast %cst : f32 to vector<8x128xf32>
    %42 = arith.select %33, %40, %41 : vector<8x128xi1>, vector<8x128xf32>
    %43 = arith.divf %36, %42 : vector<8x128xf32>
    %cst_5 = arith.constant 0.000000e+00 : f32
    %44 = vector.broadcast %cst_5 : f32 to vector<8x128xf32>
    %45 = arith.select %33, %43, %44 : vector<8x128xi1>, vector<8x128xf32>
    %cst_6 = arith.constant dense<0xFF800000> : vector<128xf32>
    %46 = vector.multi_reduction <maximumf>, %45, %cst_6 [0] : vector<8x128xf32> to vector<128xf32>
    %47 = vector.shape_cast %46 : vector<128xf32> to vector<1x128xf32>
    %48 = tpu.iota {dimensions = array<i32: 0>} : vector<8x128xi32>
    %49 = vector.broadcast %47 : vector<1x128xf32> to vector<8x128xf32>
    %50 = arith.cmpf oeq, %45, %49 : vector<8x128xf32>
    %c8_i32 = arith.constant 8 : i32
    %51 = vector.broadcast %c8_i32 : i32 to vector<8x128xi32>
    %52 = arith.select %50, %48, %51 : vector<8x128xi1>, vector<8x128xi32>
    %cst_7 = arith.constant dense<2147483647> : vector<128xi32>
    %53 = vector.multi_reduction <minsi>, %52, %cst_7 [0] : vector<8x128xi32> to vector<128xi32>
    %54 = vector.shape_cast %53 : vector<128xi32> to vector<1x128xi32>
    %55 = vector.broadcast %54 : vector<1x128xi32> to vector<8x128xi32>
    %56 = arith.cmpi eq, %48, %55 : vector<8x128xi32>
    %57 = arith.extui %56 : vector<8x128xi1> to vector<8x128xi32>
    %58 = arith.sitofp %57 : vector<8x128xi32> to vector<8x128xf32>
    %59 = vector.broadcast %8 : vector<8x1xf32> to vector<8x128xf32>
    %60 = arith.mulf %58, %59 : vector<8x128xf32>
    %cst_8 = arith.constant dense<0.000000e+00> : vector<128xf32>
    %61 = vector.multi_reduction <add>, %60, %cst_8 [0] : vector<8x128xf32> to vector<128xf32>
    %62 = vector.shape_cast %61 : vector<128xf32> to vector<1x128xf32>
    %63 = vector.broadcast %9 : vector<8x1xf32> to vector<8x128xf32>
    %64 = arith.mulf %58, %63 : vector<8x128xf32>
    %cst_9 = arith.constant dense<0.000000e+00> : vector<128xf32>
    %65 = vector.multi_reduction <add>, %64, %cst_9 [0] : vector<8x128xf32> to vector<128xf32>
    %66 = vector.shape_cast %65 : vector<128xf32> to vector<1x128xf32>
    %67 = vector.broadcast %10 : vector<8x1xf32> to vector<8x128xf32>
    %68 = arith.mulf %58, %67 : vector<8x128xf32>
    %cst_10 = arith.constant dense<0.000000e+00> : vector<128xf32>
    %69 = vector.multi_reduction <add>, %68, %cst_10 [0] : vector<8x128xf32> to vector<128xf32>
    %70 = vector.shape_cast %69 : vector<128xf32> to vector<1x128xf32>
    %71 = vector.broadcast %11 : vector<8x1xf32> to vector<8x128xf32>
    %72 = arith.mulf %58, %71 : vector<8x128xf32>
    %cst_11 = arith.constant dense<0.000000e+00> : vector<128xf32>
    %73 = vector.multi_reduction <add>, %72, %cst_11 [0] : vector<8x128xf32> to vector<128xf32>
    %74 = vector.shape_cast %73 : vector<128xf32> to vector<1x128xf32>
    %75 = vector.broadcast %12 : vector<8x1xf32> to vector<8x128xf32>
    %76 = arith.mulf %58, %75 : vector<8x128xf32>
    %cst_12 = arith.constant dense<0.000000e+00> : vector<128xf32>
    %77 = vector.multi_reduction <add>, %76, %cst_12 [0] : vector<8x128xf32> to vector<128xf32>
    %78 = vector.shape_cast %77 : vector<128xf32> to vector<1x128xf32>
    %79 = arith.subf %6, %4 : vector<1x128xf32>
    %80 = arith.subf %7, %5 : vector<1x128xf32>
    %cst_13 = arith.constant 5.000000e-01 : f32
    %81 = vector.broadcast %cst_13 : f32 to vector<1x128xf32>
    %82 = arith.mulf %81, %79 : vector<1x128xf32>
    %83 = arith.addf %4, %82 : vector<1x128xf32>
    %cst_14 = arith.constant 5.000000e-01 : f32
    %84 = vector.broadcast %cst_14 : f32 to vector<1x128xf32>
    %85 = arith.mulf %84, %80 : vector<1x128xf32>
    %86 = arith.addf %5, %85 : vector<1x128xf32>
    %87 = arith.subf %70, %62 : vector<1x128xf32>
    %88 = arith.subf %74, %66 : vector<1x128xf32>
    %cst_15 = arith.constant 5.000000e-01 : f32
    %89 = vector.broadcast %cst_15 : f32 to vector<1x128xf32>
    %90 = arith.mulf %89, %87 : vector<1x128xf32>
    %91 = arith.addf %62, %90 : vector<1x128xf32>
    %cst_16 = arith.constant 5.000000e-01 : f32
    %92 = vector.broadcast %cst_16 : f32 to vector<1x128xf32>
    %93 = arith.mulf %92, %88 : vector<1x128xf32>
    %94 = arith.addf %66, %93 : vector<1x128xf32>
    %cst_17 = arith.constant 1.1920929E-7 : f32
    %95 = vector.broadcast %cst_17 : f32 to vector<1x128xf32>
    %96 = arith.maximumf %79, %95 : vector<1x128xf32>
    %97 = tpu.reciprocal %96 : vector<1x128xf32> -> vector<1x128xf32>
    %cst_18 = arith.constant 1.1920929E-7 : f32
    %98 = vector.broadcast %cst_18 : f32 to vector<1x128xf32>
    %99 = arith.maximumf %80, %98 : vector<1x128xf32>
    %100 = tpu.reciprocal %99 : vector<1x128xf32> -> vector<1x128xf32>
    %101 = arith.subf %91, %83 : vector<1x128xf32>
    %102 = arith.mulf %101, %97 : vector<1x128xf32>
    %103 = arith.subf %94, %86 : vector<1x128xf32>
    %104 = arith.mulf %103, %100 : vector<1x128xf32>
    %cst_19 = arith.constant 1.1920929E-7 : f32
    %105 = vector.broadcast %cst_19 : f32 to vector<1x128xf32>
    %106 = arith.maximumf %87, %105 : vector<1x128xf32>
    %107 = arith.mulf %106, %97 : vector<1x128xf32>
    %108 = math.log %107 : vector<1x128xf32>
    %cst_20 = arith.constant 1.1920929E-7 : f32
    %109 = vector.broadcast %cst_20 : f32 to vector<1x128xf32>
    %110 = arith.maximumf %88, %109 : vector<1x128xf32>
    %111 = arith.mulf %110, %100 : vector<1x128xf32>
    %112 = math.log %111 : vector<1x128xf32>
    %cst_21 = arith.constant 5.000000e-01 : f32
    %113 = vector.broadcast %cst_21 : f32 to vector<1x128xf32>
    %114 = arith.cmpf oge, %47, %113 : vector<1x128xf32>
    %cst_22 = arith.constant 5.000000e-01 : f32
    %115 = vector.broadcast %cst_22 : f32 to vector<1x128xf32>
    %116 = arith.cmpf olt, %47, %115 : vector<1x128xf32>
    %cst_23 = arith.constant 0.000000e+00 : f32
    %117 = vector.broadcast %cst_23 : f32 to vector<1x128xf32>
    %118 = arith.cmpf oge, %47, %117 : vector<1x128xf32>
    %119 = arith.andi %116, %118 : vector<1x128xi1>
    %120 = arith.extui %114 : vector<1x128xi1> to vector<1x128xi32>
    %121 = arith.extui %119 : vector<1x128xi1> to vector<1x128xi32>
    %122 = tpu.iota {dimensions = array<i32: 1>} : vector<1x128xi32>
    %123 = tpu.concatenate %120, %121 in 0 : vector<1x128xi32>, vector<1x128xi32> -> vector<2x128xi32>
    %c1_i32 = arith.constant 1 : i32
    %124 = tpu.dynamic_rotate %123 by %c1_i32 dim 1 : vector<2x128xi32>, i32 -> vector<2x128xi32>
    %c1_i32_24 = arith.constant 1 : i32
    %125 = vector.broadcast %c1_i32_24 : i32 to vector<1x128xi32>
    %126 = arith.cmpi sge, %122, %125 : vector<1x128xi32>
    %c0_i32 = arith.constant 0 : i32
    %127 = vector.shape_cast %126 : vector<1x128xi1> to vector<1x128xi1>
    %128 = vector.broadcast %127 : vector<1x128xi1> to vector<2x128xi1>
    %129 = vector.broadcast %c0_i32 : i32 to vector<2x128xi32>
    %130 = arith.select %128, %124, %129 : vector<2x128xi1>, vector<2x128xi32>
    %131 = arith.addi %123, %130 : vector<2x128xi32>
    %c2_i32 = arith.constant 2 : i32
    %132 = tpu.dynamic_rotate %131 by %c2_i32 dim 1 : vector<2x128xi32>, i32 -> vector<2x128xi32>
    %c2_i32_25 = arith.constant 2 : i32
    %133 = vector.broadcast %c2_i32_25 : i32 to vector<1x128xi32>
    %134 = arith.cmpi sge, %122, %133 : vector<1x128xi32>
    %c0_i32_26 = arith.constant 0 : i32
    %135 = vector.shape_cast %134 : vector<1x128xi1> to vector<1x128xi1>
    %136 = vector.broadcast %135 : vector<1x128xi1> to vector<2x128xi1>
    %137 = vector.broadcast %c0_i32_26 : i32 to vector<2x128xi32>
    %138 = arith.select %136, %132, %137 : vector<2x128xi1>, vector<2x128xi32>
    %139 = arith.addi %131, %138 : vector<2x128xi32>
    %c4_i32 = arith.constant 4 : i32
    %140 = tpu.dynamic_rotate %139 by %c4_i32 dim 1 : vector<2x128xi32>, i32 -> vector<2x128xi32>
    %c4_i32_27 = arith.constant 4 : i32
    %141 = vector.broadcast %c4_i32_27 : i32 to vector<1x128xi32>
    %142 = arith.cmpi sge, %122, %141 : vector<1x128xi32>
    %c0_i32_28 = arith.constant 0 : i32
    %143 = vector.shape_cast %142 : vector<1x128xi1> to vector<1x128xi1>
    %144 = vector.broadcast %143 : vector<1x128xi1> to vector<2x128xi1>
    %145 = vector.broadcast %c0_i32_28 : i32 to vector<2x128xi32>
    %146 = arith.select %144, %140, %145 : vector<2x128xi1>, vector<2x128xi32>
    %147 = arith.addi %139, %146 : vector<2x128xi32>
    %c8_i32_29 = arith.constant 8 : i32
    %148 = tpu.dynamic_rotate %147 by %c8_i32_29 dim 1 : vector<2x128xi32>, i32 -> vector<2x128xi32>
    %c8_i32_30 = arith.constant 8 : i32
    %149 = vector.broadcast %c8_i32_30 : i32 to vector<1x128xi32>
    %150 = arith.cmpi sge, %122, %149 : vector<1x128xi32>
    %c0_i32_31 = arith.constant 0 : i32
    %151 = vector.shape_cast %150 : vector<1x128xi1> to vector<1x128xi1>
    %152 = vector.broadcast %151 : vector<1x128xi1> to vector<2x128xi1>
    %153 = vector.broadcast %c0_i32_31 : i32 to vector<2x128xi32>
    %154 = arith.select %152, %148, %153 : vector<2x128xi1>, vector<2x128xi32>
    %155 = arith.addi %147, %154 : vector<2x128xi32>
    %c16_i32 = arith.constant 16 : i32
    %156 = tpu.dynamic_rotate %155 by %c16_i32 dim 1 : vector<2x128xi32>, i32 -> vector<2x128xi32>
    %c16_i32_32 = arith.constant 16 : i32
    %157 = vector.broadcast %c16_i32_32 : i32 to vector<1x128xi32>
    %158 = arith.cmpi sge, %122, %157 : vector<1x128xi32>
    %c0_i32_33 = arith.constant 0 : i32
    %159 = vector.shape_cast %158 : vector<1x128xi1> to vector<1x128xi1>
    %160 = vector.broadcast %159 : vector<1x128xi1> to vector<2x128xi1>
    %161 = vector.broadcast %c0_i32_33 : i32 to vector<2x128xi32>
    %162 = arith.select %160, %156, %161 : vector<2x128xi1>, vector<2x128xi32>
    %163 = arith.addi %155, %162 : vector<2x128xi32>
    %c32_i32 = arith.constant 32 : i32
    %164 = tpu.dynamic_rotate %163 by %c32_i32 dim 1 : vector<2x128xi32>, i32 -> vector<2x128xi32>
    %c32_i32_34 = arith.constant 32 : i32
    %165 = vector.broadcast %c32_i32_34 : i32 to vector<1x128xi32>
    %166 = arith.cmpi sge, %122, %165 : vector<1x128xi32>
    %c0_i32_35 = arith.constant 0 : i32
    %167 = vector.shape_cast %166 : vector<1x128xi1> to vector<1x128xi1>
    %168 = vector.broadcast %167 : vector<1x128xi1> to vector<2x128xi1>
    %169 = vector.broadcast %c0_i32_35 : i32 to vector<2x128xi32>
    %170 = arith.select %168, %164, %169 : vector<2x128xi1>, vector<2x128xi32>
    %171 = arith.addi %163, %170 : vector<2x128xi32>
    %c64_i32 = arith.constant 64 : i32
    %172 = tpu.dynamic_rotate %171 by %c64_i32 dim 1 : vector<2x128xi32>, i32 -> vector<2x128xi32>
    %c64_i32_36 = arith.constant 64 : i32
    %173 = vector.broadcast %c64_i32_36 : i32 to vector<1x128xi32>
    %174 = arith.cmpi sge, %122, %173 : vector<1x128xi32>
    %c0_i32_37 = arith.constant 0 : i32
    %175 = vector.shape_cast %174 : vector<1x128xi1> to vector<1x128xi1>
    %176 = vector.broadcast %175 : vector<1x128xi1> to vector<2x128xi1>
    %177 = vector.broadcast %c0_i32_37 : i32 to vector<2x128xi32>
    %178 = arith.select %176, %172, %177 : vector<2x128xi1>, vector<2x128xi32>
    %179 = arith.addi %171, %178 : vector<2x128xi32>
    %180 = vector.extract_strided_slice %179 {offsets = [0, 0], sizes = [1, 128], strides = [1, 1]} : vector<2x128xi32> to vector<1x128xi32>
    %c1_i32_38 = arith.constant 1 : i32
    %181 = vector.broadcast %c1_i32_38 : i32 to vector<1x128xi32>
    %182 = arith.subi %180, %181 : vector<1x128xi32>
    %183 = vector.extract_strided_slice %179 {offsets = [1, 0], sizes = [1, 128], strides = [1, 1]} : vector<2x128xi32> to vector<1x128xi32>
    %c1_i32_39 = arith.constant 1 : i32
    %184 = vector.broadcast %c1_i32_39 : i32 to vector<1x128xi32>
    %185 = arith.subi %183, %184 : vector<1x128xi32>
    %cst_40 = arith.constant dense<0> : vector<1xi32>
    %186 = vector.multi_reduction <add>, %120, %cst_40 [1] : vector<1x128xi32> to vector<1xi32>
    %187 = vector.shape_cast %186 : vector<1xi32> to vector<1x1xi32>
    %cst_41 = arith.constant dense<0> : vector<1xi32>
    %188 = vector.multi_reduction <add>, %121, %cst_41 [1] : vector<1x128xi32> to vector<1xi32>
    %189 = vector.shape_cast %188 : vector<1xi32> to vector<1x1xi32>
    %c32_i32_42 = arith.constant 32 : i32
    %190 = vector.broadcast %c32_i32_42 : i32 to vector<1x1xi32>
    %191 = arith.minsi %190, %187 : vector<1x1xi32>
    %c128_i32 = arith.constant 128 : i32
    %192 = vector.broadcast %c128_i32 : i32 to vector<1x1xi32>
    %193 = arith.subi %192, %191 : vector<1x1xi32>
    %194 = arith.minsi %193, %189 : vector<1x1xi32>
    %195 = vector.broadcast %191 : vector<1x1xi32> to vector<1x128xi32>
    %196 = arith.cmpi slt, %182, %195 : vector<1x128xi32>
    %197 = arith.andi %114, %196 : vector<1x128xi1>
    %198 = vector.broadcast %194 : vector<1x1xi32> to vector<1x128xi32>
    %199 = arith.cmpi slt, %185, %198 : vector<1x128xi32>
    %200 = arith.andi %119, %199 : vector<1x128xi1>
    %201 = vector.broadcast %191 : vector<1x1xi32> to vector<1x128xi32>
    %202 = arith.addi %201, %185 : vector<1x128xi32>
    %c128_i32_43 = arith.constant 128 : i32
    %203 = vector.broadcast %c128_i32_43 : i32 to vector<1x128xi32>
    %204 = arith.select %200, %202, %203 : vector<1x128xi1>, vector<1x128xi32>
    %205 = arith.select %197, %182, %204 : vector<1x128xi1>, vector<1x128xi32>
    %206 = arith.sitofp %205 : vector<1x128xi32> to vector<1x128xf32>
    %207 = vector.shape_cast %206 : vector<1x128xf32> to vector<1x128xf32>
    %208 = vector.broadcast %207 : vector<1x128xf32> to vector<8x128xf32>
    %209 = tpu.transpose %208, [1, 0] : vector<8x128xf32> -> vector<128x8xf32>
    %210 = vector.extract_strided_slice %209 {offsets = [0, 0], sizes = [128, 1], strides = [1, 1]} : vector<128x8xf32> to vector<128x1xf32>
    %211 = arith.fptosi %210 : vector<128x1xf32> to vector<128x1xi32>
    %212 = tpu.iota {dimensions = array<i32: 1>} : vector<128x128xi32>
    %213 = vector.broadcast %211 : vector<128x1xi32> to vector<128x128xi32>
    %214 = arith.cmpi eq, %212, %213 : vector<128x128xi32>
    %215 = arith.extui %214 : vector<128x128xi1> to vector<128x128xi32>
    %216 = arith.sitofp %215 : vector<128x128xi32> to vector<128x128xf32>
    %217 = tpu.concatenate %1, %102, %104, %108, %112, %78 in 0 : vector<4x128xf32>, vector<1x128xf32>, vector<1x128xf32>, vector<1x128xf32>, vector<1x128xf32>, vector<1x128xf32> -> vector<9x128xf32>
    %cst_44 = arith.constant dense<0.000000e+00> : vector<9x128xf32>
    %218 = tpu.matmul %217, %216, %cst_44 {dimension_numbers = #tpu.dot_dimension_numbers<[1], [0], [0], [1], [0, 0, 1, 1], [], []>} : vector<9x128xf32>, vector<128x128xf32>, vector<9x128xf32> -> vector<9x128xf32>
    %219 = tpu.iota {dimensions = array<i32: 1>} : vector<1x128xi32>
    %220 = vector.broadcast %191 : vector<1x1xi32> to vector<1x128xi32>
    %221 = arith.cmpi slt, %219, %220 : vector<1x128xi32>
    %222 = vector.extract_strided_slice %218 {offsets = [8, 0], sizes = [1, 128], strides = [1, 1]} : vector<9x128xf32> to vector<1x128xf32>
    %cst_45 = arith.constant 0.000000e+00 : f32
    %223 = vector.broadcast %cst_45 : f32 to vector<1x128xf32>
    %224 = arith.select %221, %222, %223 : vector<1x128xi1>, vector<1x128xf32>
    %225 = arith.addi %191, %194 : vector<1x1xi32>
    %226 = vector.broadcast %225 : vector<1x1xi32> to vector<1x128xi32>
    %227 = arith.cmpi slt, %219, %226 : vector<1x128xi32>
    %228 = arith.extui %227 : vector<1x128xi1> to vector<1x128xi32>
    %cst_46 = arith.constant 5.000000e-01 : f32
    %229 = vector.broadcast %cst_46 : f32 to vector<1x128xf32>
    %230 = arith.addf %224, %229 : vector<1x128xf32>
    %231 = arith.fptosi %230 : vector<1x128xf32> to vector<1x128xi32>
    %232 = vector.extract_strided_slice %218 {offsets = [0, 0], sizes = [8, 128], strides = [1, 1]} : vector<9x128xf32> to vector<8x128xf32>
    %c0_47 = arith.constant 0 : index
    %c0_48 = arith.constant 0 : index
    %c0_49 = arith.constant 0 : index
    %233 = vector.load %arg3[%c0_47, %c0_48, %c0_49] : memref<1x8x128xf32, #tpu.memory_space<vmem>>, vector<1x8x128xf32>
    %234 = vector.shape_cast %233 : vector<1x8x128xf32> to vector<8x128xf32>
    %235 = vector.shape_cast %232 : vector<8x128xf32> to vector<1x8x128xf32>
    tpu.vector_store %arg3[%c0_47, %c0_48, %c0_49], %235 {strides = array<i32>} : memref<1x8x128xf32, #tpu.memory_space<vmem>>, vector<1x8x128xf32>,
    %236 = tpu.concatenate %231, %228 in 0 : vector<1x128xi32>, vector<1x128xi32> -> vector<2x128xi32>
    %c0_50 = arith.constant 0 : index
    %c0_51 = arith.constant 0 : index
    %c0_52 = arith.constant 0 : index
    %237 = vector.load %arg4[%c0_50, %c0_51, %c0_52] : memref<1x2x128xi32, #tpu.memory_space<vmem>>, vector<1x2x128xi32>
    %238 = vector.shape_cast %237 : vector<1x2x128xi32> to vector<2x128xi32>
    %239 = vector.shape_cast %236 : vector<2x128xi32> to vector<1x2x128xi32>
    tpu.vector_store %arg4[%c0_50, %c0_51, %c0_52], %239 {strides = array<i32>} : memref<1x2x128xi32, #tpu.memory_space<vmem>>, vector<1x2x128xi32>,
    return
  }
  func.func @transform_0(%arg0: i32) -> (i32, i32, i32) {
    %c0_i32 = arith.constant 0 : i32
    %c0_i32_0 = arith.constant 0 : i32
    %c0_i32_1 = arith.constant 0 : i32
    return %arg0, %c0_i32, %c0_i32_0 : i32, i32, i32
  }
  func.func @transform_1(%arg0: i32) -> (i32, i32, i32) {
    %c0_i32 = arith.constant 0 : i32
    %c0_i32_0 = arith.constant 0 : i32
    %c0_i32_1 = arith.constant 0 : i32
    return %arg0, %c0_i32, %c0_i32_0 : i32, i32, i32
  }
  func.func @transform_2(%arg0: i32) -> (i32, i32, i32) {
    %c0_i32 = arith.constant 0 : i32
    %c0_i32_0 = arith.constant 0 : i32
    %c0_i32_1 = arith.constant 0 : i32
    return %arg0, %c0_i32, %c0_i32_0 : i32, i32, i32
  }
  func.func @transform_3(%arg0: i32) -> (i32, i32, i32) {
    %c0_i32 = arith.constant 0 : i32
    %c0_i32_0 = arith.constant 0 : i32
    %c0_i32_1 = arith.constant 0 : i32
    return %arg0, %c0_i32, %c0_i32_0 : i32, i32, i32
  }
}

</mosaic_0001>

<bundles_post_ra>
// kernel: proposal_target_layer.1
= control target key start
LH: loop header
LB: loop body
LE: loop exit
PB: predicated region body
PF: predicated region fallthrough
CT: control target
= control target key end

     0   :  { %s1019_s12 = smov 0   ;;  %s1225_s0 = inlined_call_operand.vmem [shape: f32[2,4,128], index: 0, kind: input, shape index: {}]   ;;  %s1226_s1 = inlined_call_operand.vmem [shape: f32[2,8,5], index: 1, kind: input, shape index: {}]   ;;  %s1227_s2 = inlined_call_operand.vmem [shape: f32[2,8,128], index: 2, kind: output, shape index: {0}]   ;;  %s1228_s3 = inlined_call_operand.vmem [shape: s32[2,2,128], index: 3, kind: output, shape index: {1}]  }
   0x1 LB: > { %s807_s13 = sadd.s32 4294967295, %s983_s12   ;;  %p811_p0 = scmp.ge.s32.totalorder %s983_s12, 1  ;;  %s983_s12 = sphi %s1019_s12, %s14_s12  }
   0x2   : > { %p148_p1 = scmp.lt.s32.totalorder %s983_s12, 3 }
   0x4   : > { %p149_p2 = pnand %p811_p0, %p148_p1 }
   0x5   : > { %p178_p3 = scmp.lt.s32.totalorder (!%p149_p2), %s807_s13, 1  ;;  %s987_s18 = smov (!%p149_p2), 2  }
   0x6   : > { %152 = sbr.rel (%p149_p2) target bundleno = 1801 (0x709), region = 28  ;;  %s990_s19 = smov (!%p149_p2), 1  }
   0x7   : > { %s992_s24 = smov (!%p149_p2), 4   ;;  %s993_s25 = smov (!%p149_p2), 8  }
   0x8   : > { %s994_s26 = smov (!%p149_p2), 16   ;;  %s995_s27 = smov (!%p149_p2), 32  }
   0x9   : > { %s996_s28 = smov (!%p149_p2), 64  }
   0xb   : > { %v985_v0 = vmov 0   ;;  %v986_v1 = vmov 2   ;;  %s1232_s13 = smov (!%p178_p3, %s807_s13), 1  ;;  %v988_v3 = vmov 1   ;;  %v989_v4 = vmov 3  }
   0xc   : > { %961 = vset.pattern.permute.xlu1 %v985_v0  ;;  %963 = vset.pattern.permute.xlu0 %v986_v1  ;;  %s813_s14 = sshll.u32 %s1232_s13, 3  ;;  %s812_s20 = sshll.u32 %s1232_s13, 2  ;;  %v214_v9 = vlaneseq  ;;  %vm368_vm3 = vcmask 1040384   ;;  %v991_v61 = vmov 0.0   ;;  %vm618_vm13 = vcmask 1043456  }
   0xd   : > { %s185_s17 = scalar_lea.vmem %s1226_s1, %s813_s14  ;;  %s181_s23 = scalar_lea.vmem %s1225_s0, %s812_s20  ;;  %vm620_vm14 = vcmask 1044480   ;;  %vm622_vm15 = vcmask 1045504  }
   0xe   : > { %v1036_v2 = vld [vmem:[%s185_s17] sm:$0xff]  ;;  %v1054_v11 = vshrl.u32 %v214_v9, 7  ;;  %s189_s4 = scalar_lea.vmem %s1227_s2, %s813_s14  ;;  %s815_s5 = sshll.u32 %s1232_s13, 1 }
   0xf   : > { %205 = vrot.lane.b32.xlu0 %v1036_v2, %s987_s18  ;;  %219 = vperm.xlu1 %961, %v1036_v2   ;;  %v1056_v12 = vld [vmem:[%s181_s23] sm:$0xf]  ;;  %s193_s8 = scalar_lea.vmem %s1228_s3, %s815_s5 }
  0x10   : > { %v197_v13 = vrot.slane %v1056_v12, 6  ;;  %v216_v14 = vsub.s32 0, %v1054_v11  ;;  %v225_v16 = vsub.s32 1, %v1054_v11  ;;  %v243_v17 = vsub.s32 3, %v1054_v11 }
  0x11   : > { %v234_v18 = vsub.s32 2, %v1054_v11 }
  0x12   : > { %v1066_v19 = vsub.f32 %v1056_v12, %v197_v13  ;;  %v217_v20 = vrot.slane %v1056_v12, %v216_v14  ;;  %v226_v21 = vrot.slane %v1056_v12, %v225_v16  ;;  %v244_v22 = vrot.slane %v1056_v12, %v243_v17 }
  0x13   : > { %962 = vset.pattern.permute.xlu1 %v988_v3  ;;  %v235_v23 = vrot.slane %v1056_v12, %v234_v18 }
  0x14   : > { %228 = vperm.xlu1 %962, %v1036_v2   ;;  %v201_v24 = vrot.slane %v1066_v19, 7  ;;  %v343_v60 = vmax.f32 %v1066_v19, 1.1920929e-07 }
  0x16   : > { %v203_v31 = vmul.f32 %v201_v24, %v1066_v19 }
  0x18   : > { %964 = vset.pattern.permute.xlu1 %v989_v4  ;;  %v259_v34 = vrot.slane %v203_v31, %v243_v17 }
  0x19   : > { %246 = vperm.xlu1 %964, %v1036_v2  }
  0x81   : > { %v206_v5 = vpop.permute.xlu0 %205 }
  0x82   : > { %v208_v6 = vsub.f32 %v1036_v2, %v206_v5 }
  0x84   : > { %210 = vrot.lane.b32.xlu0 %v208_v6, %s990_s19 }
  0x88   : > { %237 = vperm.xlu0 %963, %v1036_v2  }
  0x8a   : > { %v1051_v10 = vpop.permute.xlu1 %219 }
  0x8b   : > { %v222_v27 = vmax.f32 %v217_v20, %v1051_v10 }
  0x8f   : > { %v1060_v15 = vpop.permute.xlu1 %228 }
  0x90   : > { %v231_v28 = vmax.f32 %v226_v21, %v1060_v15 }
  0x94   : > { %v247_v25 = vpop.permute.xlu1 %246 }
  0x95   : > { %v249_v29 = vmin.f32 %v244_v22, %v247_v25 }
  0x97   : > { %v253_v32 = vsub.f32 %v249_v29, %v231_v28  ;;  %vm251_vm0 = vcmp.lt.f32.partialorder %v231_v28, %v249_v29 }
  0xf6   : > { %v211_v7 = vpop.permute.xlu0 %210 }
  0xf7   : > { %v213_v8 = vmul.f32 %v211_v7, %v208_v6 }
  0xf9   : > { %262 = vperm.xlu1 %964, %v213_v8  }
  0xfd   : > { %965 = vset.pattern.permute.xlu1 %v985_v0 }
 0x103   : > { %v238_v26 = vpop.permute.xlu0 %237 }
 0x104   : > { %v240_v30 = vmin.f32 %v235_v23, %v238_v26 }
 0x106   : > { %v254_v33 = vsub.f32 %v240_v30, %v222_v27  ;;  %vm250_vm1 = vcmp.lt.f32.partialorder %v222_v27, %v240_v30 }
 0x107   : > { %vm252_vm2 = vmand %vm250_vm1, %vm251_vm0  ;;  %vm624_vm0 = vcmask 1046528  }
 0x108   : > { %v255_v36 = vmul.f32 %v254_v33, %v253_v32 }
 0x174   : > { %v263_v35 = vpop.permute.xlu1 %262 }
 0x175   : > { %v265_v37 = vadd.f32 %v263_v35, %v259_v34 }
 0x177   : > { %v266_v38 = vsub.f32 %v265_v37, %v255_v36 }
 0x179   : > { %v267_v39 = vsel %vm252_vm2, %v266_v38, 1.0 }
 0x17a   : > { %969 = vrcp.f32 %v267_v39 }
 0x17b   : > { %971 = vrcp.f32 %v343_v60 }
 0x187   : > { %v970_v40 = vpop.eup %969 }
 0x188   : > { %v269_v41 = vmul.f32 %v970_v40, %v255_v36  ;;  %v972_v35 = vpop.eup %971 }
 0x18a   : > { %v270_v42 = vsel %vm252_vm2, %v269_v41, 0.0 }
 0x18b   : > { %v271_v43 = vrot.slane %v270_v42, 4 }
 0x18d   : > { %v272_v44 = vmax.f32 %v270_v42, %v271_v43 }
 0x18f   : > { %v273_v45 = vrot.slane %v272_v44, 2 }
 0x191   : > { %v274_v46 = vmax.f32 %v272_v44, %v273_v45 }
 0x193   : > { %v275_v47 = vrot.slane %v274_v46, 1 }
 0x195   : > { %v1078_v48 = vmax.f32 %v274_v46, %v275_v47 }
 0x197   : > { %vm279_vm4 = vcmp.eq.f32.partialorder %v270_v42, %v1078_v48  ;;  %vm360_vm5 = vcmp.ge.f32.partialorder %v1078_v48, 0.5  ;;  %vm361_vm6 = vcmp.lt.f32.partialorder %v1078_v48, 0.5  ;;  %vm362_vm7 = vcmp.ge.f32.partialorder %v1078_v48, 0.0 }
 0x198   : > { %v280_v49 = vsel %vm279_vm4, %v1054_v11, 8  ;;  %vm1085_vm8 = vmand %vm361_vm6, %vm362_vm7  ;;  %v1092_v51 = vsel %vm360_vm5, 1, %v985_v0 }
 0x199   : > { %v281_v52 = vrot.slane %v280_v49, 4  ;;  %v1097_v53 = vsel %vm1085_vm8, 1, %v985_v0 }
 0x19a   : > { %v1102_v54 = vsel %vm368_vm3, %v1092_v51, %v1097_v53 }
 0x19b   : > { %vm282_vm9 = vcmp.lt.s32.totalorder %v280_v49, %v281_v52  ;;  %370 = vrot.lane.b32.xlu0 %v1102_v54, %s990_s19 }
 0x19c   : > { %v283_v55 = vsel %vm282_vm9, %v280_v49, %v281_v52  ;;  %v347_v49 = vrot.slane %v972_v35, 2 }
 0x19d   : > { %v284_v56 = vrot.slane %v283_v55, 2 }
 0x19f   : > { %vm285_vm10 = vcmp.lt.s32.totalorder %v283_v55, %v284_v56 }
 0x1a0   : > { %v286_v57 = vsel %vm285_vm10, %v283_v55, %v284_v56 }
 0x1a1   : > { %v287_v58 = vrot.slane %v286_v57, 1 }
 0x1a3   : > { %vm288_vm11 = vcmp.lt.s32.totalorder %v286_v57, %v287_v58 }
 0x1a4   : > { %v289_v59 = vsel %vm288_vm11, %v286_v57, %v287_v58 }
 0x1a5   : > { %vm290_vm12 = vcmp.eq.s32.totalorder %v1054_v11, %v289_v59 }
 0x1a6   : > { %v1108_v62 = vsel %vm290_vm12, 1.0, %v991_v61 }
 0x1a7   : > { %v293_v63 = vmul.f32 %v1108_v62, %v1051_v10  ;;  %v300_v1 = vmul.f32 %v1108_v62, %v1060_v15  ;;  %v307_v3 = vmul.f32 %v1108_v62, %v238_v26  ;;  %v314_v4 = vmul.f32 %v1108_v62, %v247_v25 }
 0x1a8   : > { %v332_v26 = vmul.f32 0.5, %v1066_v19 }
 0x1a9   : > { %v294_v5 = vrot.slane %v293_v63, 4  ;;  %v301_v6 = vrot.slane %v300_v1, 4  ;;  %v308_v7 = vrot.slane %v307_v3, 4  ;;  %v315_v8 = vrot.slane %v314_v4, 4 }
 0x1aa   : > { %v334_v36 = vrot.slane %v332_v26, 2 }
 0x1ab   : > { %v295_v13 = vadd.f32 %v294_v5, %v293_v63  ;;  %v302_v16 = vadd.f32 %v301_v6, %v300_v1  ;;  %v309_v17 = vadd.f32 %v308_v7, %v307_v3  ;;  %v316_v18 = vadd.f32 %v315_v8, %v314_v4 }
 0x1ac   : > { %v336_v43 = vadd.f32 %v334_v36, %v1056_v12  ;;  %v1120_v8 = vand.u32 127, %v214_v9 }
 0x1ad   : > { %v296_v20 = vrot.slane %v295_v13, 2  ;;  %v303_v21 = vrot.slane %v302_v16, 2  ;;  %v310_v22 = vrot.slane %v309_v17, 2  ;;  %v317_v10 = vrot.slane %v316_v18, 2 }
 0x1ae   : > { %vm372_vm1 = vcmp.ge.s32.totalorder %v1120_v8, 1  ;;  %vm379_vm2 = vcmp.ge.s32.totalorder %v1120_v8, 2  ;;  %vm386_vm4 = vcmp.ge.s32.totalorder %v1120_v8, 4  ;;  %vm393_vm6 = vcmp.ge.s32.totalorder %v1120_v8, 8 }
 0x1af   : > { %v297_v23 = vadd.f32 %v296_v20, %v295_v13  ;;  %v304_v24 = vadd.f32 %v303_v21, %v302_v16  ;;  %v311_v15 = vadd.f32 %v310_v22, %v309_v17  ;;  %v318_v27 = vadd.f32 %v317_v10, %v316_v18 }
 0x1b0   : > { %vm400_vm7 = vcmp.ge.s32.totalorder %v1120_v8, 16  ;;  %vm407_vm9 = vcmp.ge.s32.totalorder %v1120_v8, 32  ;;  %vm414_vm12 = vcmp.ge.s32.totalorder %v1120_v8, 64 }
 0x1b1   : > { %v298_v25 = vrot.slane %v297_v23, 1  ;;  %v305_v28 = vrot.slane %v304_v24, 1  ;;  %v312_v29 = vrot.slane %v311_v15, 1  ;;  %v319_v30 = vrot.slane %v318_v27, 1 }
 0x1b3   : > { %v299_v31 = vadd.f32 %v298_v25, %v297_v23  ;;  %v306_v32 = vadd.f32 %v305_v28, %v304_v24  ;;  %v313_v33 = vadd.f32 %v312_v29, %v311_v15  ;;  %v320_v34 = vadd.f32 %v319_v30, %v318_v27 }
 0x1b4   : > { %v421_v24 = vshrl.u32 %v1092_v51, 16  ;;  %v433_v27 = vshrl.u32 %v1097_v53, 16  ;;  %v432_v25 = vand.u32 65535, %v1097_v53 }
 0x1b5   : > { %v337_v37 = vsub.f32 %v313_v33, %v299_v31  ;;  %v338_v38 = vsub.f32 %v320_v34, %v306_v32 }
 0x1b6   : > { %v423_v15 = vcvt.s32.f32 %v421_v24  ;;  %v435_v26 = vcvt.s32.f32 %v433_v27  ;;  %v434_v28 = vcvt.s32.f32 %v432_v25 }
 0x1b7   : > { %v339_v39 = vmul.f32 0.5, %v337_v37  ;;  %v352_v40 = vmax.f32 %v337_v37, 1.1920929e-07  ;;  %v356_v41 = vmax.f32 %v338_v38, 1.1920929e-07  ;;  %v341_v42 = vmul.f32 0.5, %v338_v38 }
 0x1b9   : > { %v340_v44 = vadd.f32 %v339_v39, %v299_v31  ;;  %v353_v19 = vmul.f32 %v972_v35, %v352_v40  ;;  %v357_v45 = vmul.f32 %v972_v35, %v356_v41  ;;  %v342_v46 = vadd.f32 %v341_v42, %v306_v32 }
 0x1ba   : > { %v420_v32 = vand.u32 65535, %v1092_v51 }
 0x1bb   : > { %973 = vlog2.f32 %v353_v19  ;;  %v345_v47 = vsub.f32 %v340_v44, %v336_v43  ;;  %v350_v52 = vsub.f32 %v342_v46, %v336_v43 }
 0x1bc   : > { %975 = vlog2.f32 %v357_v45  ;;  %v422_v33 = vcvt.s32.f32 %v420_v32 }
 0x1bd   : > { %v349_v55 = vmul.f32 %v347_v49, %v345_v47  ;;  %v351_v56 = vmul.f32 %v350_v52, %v347_v49 }
 0x1bf   : > { %v607_v57 = vrot.slane %v349_v55, 4  ;;  %v610_v59 = vrot.slane %v351_v56, 4 }
 0x1c1   : > { %v619_v63 = vsel %vm618_vm13, %v1056_v12, %v607_v57 }
 0x1c2   : > { %v621_v5 = vsel %vm620_vm14, %v619_v63, %v610_v59 }
 0x1c8   : > { %v974_v58 = vpop.eup %973 }
 0x1c9   : > { %v976_v60 = vpop.eup %975  ;;  %v355_v61 = vmul.f32 0.6931472, %v974_v58 }
 0x1ca   : > { %v359_v1 = vmul.f32 0.6931472, %v976_v60 }
 0x1cb   : > { %v613_v3 = vrot.slane %v355_v61, 4 }
 0x1cc   : > { %v616_v4 = vrot.slane %v359_v1, 4 }
 0x1cd   : > { %v623_v6 = vsel %vm622_vm15, %v621_v5, %v613_v3 }
 0x1ce   : > { %v625_v7 = vsel %vm624_vm0, %v623_v6, %v616_v4 }
 0x1cf   : > { %902 = vmatprep.mubr.f32.mxu0 %v625_v7 }
 0x20d   : > { %v371_v13 = vpop.permute.xlu0 %370 }
 0x20e   : > { %v375_v16 = vsel %vm372_vm1, %v371_v13, 0 }
 0x20f   : > { %v376_v17 = vadd.s32 %v375_v16, %v1102_v54 }
 0x211   : > { %377 = vrot.lane.b32.xlu1 %v376_v17, %s987_s18 }
 0x283   : > { %v378_v12 = vpop.permute.xlu1 %377 }
 0x284   : > { %v382_v18 = vsel %vm379_vm2, %v378_v12, 0 }
 0x285   : > { %v383_v20 = vadd.s32 %v382_v18, %v376_v17 }
 0x287   : > { %384 = vrot.lane.b32.xlu0 %v383_v20, %s992_s24 }
 0x2f9   : > { %v385_v21 = vpop.permute.xlu0 %384 }
 0x2fa   : > { %v389_v9 = vsel %vm386_vm4, %v385_v21, 0 }
 0x2fb   : > { %v390_v22 = vadd.s32 %v389_v9, %v383_v20 }
 0x2fd   : > { %391 = vrot.lane.b32.xlu1 %v390_v22, %s993_s25 }
 0x36f   : > { %v392_v10 = vpop.permute.xlu1 %391 }
 0x370   : > { %v396_v54 = vsel %vm393_vm6, %v392_v10, 0 }
 0x371   : > { %v397_v23 = vadd.s32 %v396_v54, %v390_v22 }
 0x373   : > { %398 = vrot.lane.b32.xlu0 %v397_v23, %s994_s26 }
 0x392   : > { %426 = vadd.xlane.f32.xlu0 %v423_v15 }
 0x396   : > { %438 = vadd.xlane.f32.xlu0 %v435_v26 }
 0x39a   : > { %436 = vadd.xlane.f32.xlu0 %v434_v28 }
 0x3e5   : > { %v399_v29 = vpop.permute.xlu0 %398 }
 0x3e6   : > { %v403_v30 = vsel %vm400_vm7, %v399_v29, 0 }
 0x3e7   : > { %v404_v31 = vadd.s32 %v403_v30, %v397_v23 }
 0x3e9   : > { %405 = vrot.lane.b32.xlu1 %v404_v31, %s995_s27 }
 0x40d   : > { %424 = vadd.xlane.f32.xlu1 %v422_v33 }
 0x41b   : > { %v427_v53 = vpop.xlane.xlu0 %426 }
 0x41c   : > { %v429_v38 = vcvt.f32.s32 %v427_v53 }
 0x41e   : > { %v430_v41 = vshll.u32 %v429_v38, 16 }
 0x41f   : > { %v439_v37 = vpop.xlane.xlu0 %438 }
 0x420   : > { %v441_v42 = vcvt.f32.s32 %v439_v37 }
 0x422   : > { %v442_v51 = vshll.u32 %v441_v42, 16 }
 0x423   : > { %v437_v39 = vpop.xlane.xlu0 %436 }
 0x424   : > { %v440_v44 = vcvt.f32.s32 %v437_v39  ;;  %v997_v39 = vmov 4  }
 0x426   : > { %v443_v46 = vadd.s32 %v442_v51, %v440_v44 }
 0x45b   : > { %v406_v34 = vpop.permute.xlu1 %405 }
 0x45c   : > { %v410_v35 = vsel %vm407_vm9, %v406_v34, 0 }
 0x45d   : > { %v411_v36 = vadd.s32 %v410_v35, %v404_v31 }
 0x45f   : > { %412 = vrot.lane.b32.xlu1 %v411_v36, %s996_s28 }
 0x496   : > { %v425_v40 = vpop.xlane.xlu1 %424 }
 0x497   : > { %v428_v43 = vcvt.f32.s32 %v425_v40 }
 0x499   : > { %v431_v19 = vadd.s32 %v430_v41, %v428_v43 }
 0x49b   : > { %vm444_vm10 = vcmp.lt.s32.totalorder %v431_v19, 32 }
 0x49c   : > { %v1134_v45 = vsel %vm444_vm10, %v431_v19, 32 }
 0x49d   : > { %v446_v47 = vsub.s32 128, %v1134_v45 }
 0x49f   : > { %vm447_vm11 = vcmp.lt.s32.totalorder %v446_v47, %v443_v46 }
 0x4a0   : > { %v448_v49 = vsel %vm447_vm11, %v446_v47, %v443_v46 }
 0x4a1   : > { %v1138_v52 = vadd.s32 %v448_v49, %v1134_v45 }
 0x4d1   : > { %v413_v55 = vpop.permute.xlu1 %412 }
 0x4d2   : > { %v417_v56 = vsel %vm414_vm12, %v413_v55, 0 }
 0x4d3   : > { %v418_v57 = vadd.s32 %v417_v56, %v411_v36 }
 0x4d5   : > { %v817_v58 = vadd.s32 4294967295, %v418_v57 }
 0x4d7   : > { %vm451_vm13 = vcmp.lt.s32.totalorder %v817_v58, %v448_v49  ;;  %v453_v59 = vadd.s32 %v817_v58, %v1134_v45  ;;  %vm449_vm15 = vcmp.lt.s32.totalorder %v817_v58, %v1134_v45 }
 0x4d8   : > { %vm452_vm14 = vmand %vm1085_vm8, %vm451_vm13 }
 0x4d9   : > { %v454_v60 = vsel %vm452_vm14, %v453_v59, 128  ;;  %vm450_vm0 = vmand %vm360_vm5, %vm449_vm15 }
 0x4da   : > { %v455_v61 = vrot.slane %v454_v60, 1 }
 0x4dc   : > { %v456_v63 = vsel %vm450_vm0, %v817_v58, %v455_v61 }
 0x4dd   : > { %v457_v1 = vcvt.s32.f32 %v456_v63 }
 0x4df   : > { %v461_v3 = vrot.slane %v457_v1, %v216_v14  ;;  %v998_v1 = vmov 1.0  }
 0x4e1   : > { %462 = vxpose.xlu0.b32.start.end [1/1] (short) %v461_v3, 128 }
 0x50a   : > { %966 = vset.pattern.permute.xlu0 %v985_v0 }
 0x55d   : > { %v1150_v4 = vpop.trf.xlu0 }
 0x55e   : > { %v905_v47 = vtrunc.f32 %v1150_v4 }
 0x561   : > { %v1152_v5 = vpop.trf.xlu0 }
 0x562   : > { %v907_v51 = vtrunc.f32 %v1152_v5 }
 0x564   : > { %v908_v49 = vcvt.f32.s32 %v907_v51 }
 0x565   : > { %v480_v50 = vpop.trf.xlu0 }
 0x566   : > { %v909_v44 = vtrunc.f32 %v480_v50 }
 0x568   : > { %v910_v46 = vcvt.f32.s32 %v909_v44 }
 0x569   : > { %v481_v6 = vpop.trf.xlu0 }
 0x56a   : > { %v911_v42 = vtrunc.f32 %v481_v6 }
 0x56c   : > { %v912_v19 = vcvt.f32.s32 %v911_v42 }
 0x56d   : > { %v482_v7 = vpop.trf.xlu0 }
 0x56e   : > { %v913_v40 = vtrunc.f32 %v482_v7 }
 0x570   : > { %v914_v43 = vcvt.f32.s32 %v913_v40 }
 0x571   : > { %v483_v13 = vpop.trf.xlu0 }
 0x572   : > { %v915_v38 = vtrunc.f32 %v483_v13 }
 0x574   : > { %v916_v41 = vcvt.f32.s32 %v915_v38 }
 0x575   : > { %v484_v16 = vpop.trf.xlu0 }
 0x576   : > { %v917_v36 = vtrunc.f32 %v484_v16 }
 0x578   : > { %v918_v37 = vcvt.f32.s32 %v917_v36 }
 0x579   : > { %v485_v17 = vpop.trf.xlu0 }
 0x57a   : > { %v919_v48 = vtrunc.f32 %v485_v17 }
 0x57c   : > { %v920_v12 = vcvt.f32.s32 %v919_v48 }
 0x57d   : > { %v486_v18 = vpop.trf.xlu0 }
 0x57e   : > { %v921_v20 = vtrunc.f32 %v486_v18  ;;  %532 = vperm.xlu0 %966, %v920_v12  }
 0x580   : > { %v922_v11 = vcvt.f32.s32 %v921_v20 }
 0x581   : > { %v487_v14 = vpop.trf.xlu0 }
 0x582   : > { %v923_v21 = vtrunc.f32 %v487_v14  ;;  %535 = vperm.xlu1 %965, %v922_v11  }
 0x584   : > { %v924_v9 = vcvt.f32.s32 %v923_v21 }
 0x585   : > { %v488_v22 = vpop.trf.xlu0 }
 0x586   : > { %v925_v10 = vtrunc.f32 %v488_v22  ;;  %538 = vperm.xlu1 %965, %v924_v9  }
 0x588   : > { %v926_v54 = vcvt.f32.s32 %v925_v10 }
 0x589   : > { %v489_v23 = vpop.trf.xlu0 }
 0x58a   : > { %v927_v24 = vtrunc.f32 %v489_v23  ;;  %541 = vperm.xlu1 %965, %v926_v54  }
 0x58c   : > { %v928_v15 = vcvt.f32.s32 %v927_v24 }
 0x58d   : > { %v490_v27 = vpop.trf.xlu0 }
 0x58e   : > { %v929_v26 = vtrunc.f32 %v490_v27  ;;  %544 = vperm.xlu1 %965, %v928_v15  }
 0x590   : > { %v930_v25 = vcvt.f32.s32 %v929_v26 }
 0x591   : > { %v491_v28 = vpop.trf.xlu0 }
 0x592   : > { %v931_v29 = vtrunc.f32 %v491_v28  ;;  %547 = vperm.xlu1 %965, %v930_v25  }
 0x594   : > { %v932_v30 = vcvt.f32.s32 %v931_v29 }
 0x595   : > { %v492_v31 = vpop.trf.xlu0 }
 0x596   : > { %v933_v32 = vtrunc.f32 %v492_v31  ;;  %550 = vperm.xlu1 %965, %v932_v30  }
 0x598   : > { %v934_v33 = vcvt.f32.s32 %v933_v32 }
 0x599   : > { %v493_v34 = vpop.trf.xlu0 }
 0x59a   : > { %v935_v35 = vtrunc.f32 %v493_v34  ;;  %553 = vperm.xlu1 %965, %v934_v33  }
 0x59c   : > { %v936_v53 = vcvt.f32.s32 %v935_v35 }
 0x59e   : > { %556 = vperm.xlu1 %965, %v936_v53  }
 0x5a2   : > { %529 = vperm.xlu1 %965, %v918_v37  }
 0x5a6   : > { %967 = vset.pattern.permute.xlu1 %v997_v39 }
 0x5a7   : > { %322 = vperm.xlu1 %967, %v1036_v2   ;;  %v906_v2 = vcvt.f32.s32 %v905_v47 }
 0x5ab   : > { %968 = vset.pattern.permute.xlu1 %v985_v0 }
 0x5ac   : > { %526 = vperm.xlu1 %968, %v916_v41  }
 0x5b0   : > { %523 = vperm.xlu1 %968, %v914_v43  }
 0x5b4   : > { %520 = vperm.xlu1 %968, %v912_v19  }
 0x5b8   : > { %517 = vperm.xlu1 %968, %v910_v46  }
 0x5bc   : > { %514 = vperm.xlu1 %968, %v908_v49  }
 0x5c0   : > { %511 = vperm.xlu1 %968, %v906_v2  }
 0x5f9   : > { %v533_v50 = vpop.permute.xlu0 %532 }
 0x5fa   : > { %vm565_vm10 = vcmp.eq.s32.totalorder %v1120_v8, %v533_v50 }
 0x5fd   : > { %v536_v55 = vpop.permute.xlu1 %535 }
 0x5fe   : > { %vm566_vm9 = vcmp.eq.s32.totalorder %v1120_v8, %v536_v55 }
 0x601   : > { %v539_v56 = vpop.permute.xlu1 %538 }
 0x602   : > { %vm567_vm7 = vcmp.eq.s32.totalorder %v1120_v8, %v539_v56 }
 0x605   : > { %v542_v57 = vpop.permute.xlu1 %541 }
 0x606   : > { %vm568_vm6 = vcmp.eq.s32.totalorder %v1120_v8, %v542_v57 }
 0x609   : > { %v545_v58 = vpop.permute.xlu1 %544 }
 0x60a   : > { %vm569_vm4 = vcmp.eq.s32.totalorder %v1120_v8, %v545_v58 }
 0x60d   : > { %v548_v59 = vpop.permute.xlu1 %547 }
 0x60e   : > { %vm570_vm2 = vcmp.eq.s32.totalorder %v1120_v8, %v548_v59 }
 0x611   : > { %v551_v60 = vpop.permute.xlu1 %550 }
 0x612   : > { %vm571_vm1 = vcmp.eq.s32.totalorder %v1120_v8, %v551_v60 }
 0x615   : > { %v554_v61 = vpop.permute.xlu1 %553 }
 0x616   : > { %vm572_vm8 = vcmp.eq.s32.totalorder %v1120_v8, %v554_v61 }
 0x619   : > { %v557_v63 = vpop.permute.xlu1 %556 }
 0x61a   : > { %vm573_vm5 = vcmp.eq.s32.totalorder %v1120_v8, %v557_v63 }
 0x61b   : > { %870 = vmatprep.subr.msk.mxu0 %vm573_vm5, %v998_v1 }
 0x61c   : > { %871 = vmatpush3.msk.msra.mxu0 %vm573_vm5, %v998_v1 }
 0x61d   : > { %872 = vmatprep.subr.msk.mxu0 %vm572_vm8, %v998_v1  ;;  %v530_v3 = vpop.permute.xlu1 %529 }
 0x61e   : > { %873 = vmatpush3.msk.msra.mxu0 %vm572_vm8, %v998_v1  ;;  %vm564_vm11 = vcmp.eq.s32.totalorder %v1120_v8, %v530_v3  ;;  %vm701_vm8 = vcmp.lt.s32.totalorder %v1120_v8, %v1134_v45 }
 0x61f   : > { %874 = vmatprep.subr.msk.mxu0 %vm571_vm1, %v998_v1 }
 0x620   : > { %875 = vmatpush3.msk.msra.mxu0 %vm571_vm1, %v998_v1  ;;  %vm704_vm1 = vcmp.lt.s32.totalorder %v1120_v8, %v1138_v52 }
 0x621   : > { %876 = vmatprep.subr.msk.mxu0 %vm570_vm2, %v998_v1  ;;  %v705_v45 = vsel %vm704_vm1, 1, %v985_v0 }
 0x622   : > { %877 = vmatpush3.msk.msra.mxu0 %vm570_vm2, %v998_v1  ;;  %v323_v4 = vpop.permute.xlu1 %322 }
 0x623   : > { %878 = vmatprep.subr.msk.mxu0 %vm569_vm4, %v998_v1  ;;  %v325_v5 = vmul.f32 %v1108_v62, %v323_v4 }
 0x624   : > { %879 = vmatpush3.msk.msra.mxu0 %vm569_vm4, %v998_v1 }
 0x625   : > { %880 = vmatprep.subr.msk.mxu0 %vm568_vm6, %v998_v1  ;;  %v326_v7 = vrot.slane %v325_v5, 4 }
 0x626   : > { %881 = vmatpush3.msk.msra.mxu0 %vm568_vm6, %v998_v1 }
 0x627   : > { %882 = vmatprep.subr.msk.mxu0 %vm567_vm7, %v998_v1  ;;  %v527_v6 = vpop.permute.xlu1 %526  ;;  %v327_v13 = vadd.f32 %v326_v7, %v325_v5 }
 0x628   : > { %883 = vmatpush3.msk.msra.mxu0 %vm567_vm7, %v998_v1  ;;  %vm563_vm12 = vcmp.eq.s32.totalorder %v1120_v8, %v527_v6 }
 0x629   : > { %884 = vmatprep.subr.msk.mxu0 %vm566_vm9, %v998_v1  ;;  %v328_v17 = vrot.slane %v327_v13, 2 }
 0x62a   : > { %885 = vmatpush3.msk.msra.mxu0 %vm566_vm9, %v998_v1 }
 0x62b   : > { %v524_v62 = vpop.permute.xlu1 %523  ;;  %886 = vmatprep.subr.msk.mxu0 %vm565_vm10, %v998_v1  ;;  %v329_v12 = vadd.f32 %v328_v17, %v327_v13 }
 0x62c   : > { %887 = vmatpush3.msk.msra.mxu0 %vm565_vm10, %v998_v1  ;;  %vm562_vm13 = vcmp.eq.s32.totalorder %v1120_v8, %v524_v62 }
 0x62d   : > { %888 = vmatprep.subr.msk.mxu0 %vm564_vm11, %v998_v1  ;;  %v330_v20 = vrot.slane %v329_v12, 1 }
 0x62e   : > { %889 = vmatpush3.msk.msra.mxu0 %vm564_vm11, %v998_v1 }
 0x62f   : > { %v521_v16 = vpop.permute.xlu1 %520  ;;  %890 = vmatprep.subr.msk.mxu0 %vm563_vm12, %v998_v1  ;;  %v331_v14 = vadd.f32 %v330_v20, %v329_v12 }
 0x630   : > { %891 = vmatpush3.msk.msra.mxu0 %vm563_vm12, %v998_v1  ;;  %vm561_vm14 = vcmp.eq.s32.totalorder %v1120_v8, %v521_v16 }
 0x631   : > { %892 = vmatprep.subr.msk.mxu0 %vm562_vm13, %v998_v1 }
 0x632   : > { %893 = vmatpush3.msk.msra.mxu0 %vm562_vm13, %v998_v1 }
 0x633   : > { %v518_v48 = vpop.permute.xlu1 %517  ;;  %894 = vmatprep.subr.msk.mxu0 %vm561_vm14, %v998_v1 }
 0x634   : > { %vm560_vm15 = vcmp.eq.s32.totalorder %v1120_v8, %v518_v48  ;;  %895 = vmatpush3.msk.msra.mxu0 %vm561_vm14, %v998_v1 }
 0x635   : > { %896 = vmatprep.subr.msk.mxu0 %vm560_vm15, %v998_v1 }
 0x636   : > { %897 = vmatpush3.msk.msra.mxu0 %vm560_vm15, %v998_v1 }
 0x637   : > { %v515_v18 = vpop.permute.xlu1 %514 }
 0x638   : > { %vm559_vm0 = vcmp.eq.s32.totalorder %v1120_v8, %v515_v18 }
 0x639   : > { %898 = vmatprep.subr.msk.mxu0 %vm559_vm0, %v998_v1 }
 0x63a   : > { %899 = vmatpush3.msk.msra.mxu0 %vm559_vm0, %v998_v1 }
 0x63b   : > { %v512_v11 = vpop.permute.xlu1 %511 }
 0x63c   : > { %vm558_vm5 = vcmp.eq.s32.totalorder %v1120_v8, %v512_v11 }
 0x63d   : > { %900 = vmatprep.subr.msk.mxu0 %vm558_vm5, %v998_v1 }
 0x63e   : > { %901 = vmatpush3.msk.msra.mxu0 %vm558_vm5, %v998_v1 }
 0x63f   : > { %903 = vmatmul.mubr.f32.vlgmr.msra.gmra.mxu0 %v331_v14 }
 0x6ff   : > { %v904_v21 = vpop.f32.mrf.mxu0 }
 0x700   : > { %v702_v9 = vsel %vm701_vm8, %v904_v21, 0.0 }
 0x701   : > { %v706_v22 = vadd.f32 0.5, %v702_v9  ;;  %v692_v10 = vpop.f32.mrf.mxu0 }
 0x702   : > { %708 = vst [vmem:[%s189_s4] sm:$0xff] %v692_v10 }
 0x703   : > { %v937_v54 = vtrunc.f32 %v706_v22 }
 0x705   : > { %v938_v23 = vcvt.f32.s32 %v937_v54 }
 0x707   : > { %v709_v24 = vsel %vm368_vm3, %v938_v23, %v705_v45 }
 0x708   : > { %710 = vst [vmem:[%s193_s8] sm:$0x3] %v709_v24 }
 0x709 PF: > { %s14_s12 = sadd.s32 1, %s983_s12  }
 0x70a   : > { %p11_p4 = scmp.ge.s32.totalorder %s14_s12, 4  }
 0x70c   :  { %13 = sbr.rel (!%p11_p4) target bundleno = 1 (0x1), region = 73 }

</bundles_post_ra>
